<compile_context>
chip_gen: v6e
topology: v6e:2x2x1
jax: 0.10.0
libtpu: 0.0.40
codegen_flags: <defaults>
</compile_context>

<pallas_src>
import functools

import jax
import jax.numpy as jnp
import numpy as np
from jax.experimental import pallas as pl
from jax.experimental.pallas import tpu as pltpu


def _vp_kernel(hi_ref, w1_ref, b1_ref, g1_ref, be1_ref,
               w2_ref, b2_ref, gw_ref, gwsum_ref, cb_ref,
               out_ref, *, ks, pad, bblk, seq, eps, compute_dtype):
    m = bblk * seq
    ni = hi_ref.shape[-1]
    x = hi_ref[...].astype(jnp.float32).reshape(m, ni)            # (M, ni)

    # Hoisted row-index iota + per-tap validity masks (shared by both convs).
    # Row r corresponds to time t = r mod seq; taps reading outside [0, seq) are zeroed
    # (this reproduces PyTorch Conv1d zero padding AND kills the roll's cross-batch wrap).
    row = jax.lax.broadcasted_iota(jnp.int32, (m, 1), 0)
    t_idx = row % seq
    masks = []
    for k in range(ks):
        d = k - pad
        masks.append(None if d == 0 else ((t_idx + d >= 0) & (t_idx + d < seq)))

    def conv_relu(xm, w_ref, b_ref):
        # xm: (M, Cin) f32; w_ref: Ref[(ks*Cin, Cout)]; b_ref: Ref[(1, Cout)]
        taps = []
        for k in range(ks):
            d = k - pad                                           # y[t] += x[t + d] @ w[k]
            if d == 0:
                taps.append(xm)                                   # center tap: no roll/mask
            else:
                rolled = pltpu.roll(xm, shift=(-d) % m, axis=0)
                taps.append(jnp.where(masks[k], rolled, 0.0))
        xcat = jnp.concatenate(taps, axis=-1)                     # (M, ks*Cin)  im2col
        y = jnp.dot(xcat.astype(compute_dtype), w_ref[...],
                    preferred_element_type=jnp.float32) + b_ref[...]
        return jnp.maximum(y, 0.0)                                # (M, Cout) f32

    # conv1 -> relu -> (dropout = identity) -> layernorm(nf)
    # TODO(synk): dropout is eval-mode identity; training-mode dropout would use
    # pltpu.prng_seed + pltpu.stateful_bernoulli.
    h = conv_relu(x, w1_ref, b1_ref)
    mu1 = jnp.mean(h, axis=-1, keepdims=True)
    ex2 = jnp.mean(h * h, axis=-1, keepdims=True)
    var1 = jnp.maximum(ex2 - mu1 * mu1, 0.0)
    h = (h - mu1) * jax.lax.rsqrt(var1 + eps) * g1_ref[...] + be1_ref[...]

    # conv2 -> relu -> (dropout = identity) -> [layernorm(ni) + Linear(ni,1)] fused
    h = conv_relu(h, w2_ref, b2_ref)
    mu2 = jnp.mean(h, axis=-1, keepdims=True)
    ex2 = jnp.mean(h * h, axis=-1, keepdims=True)
    var2 = jnp.maximum(ex2 - mu2 * mu2, 0.0)
    rstd = jax.lax.rsqrt(var2 + eps)
    s = jnp.sum(h * gw_ref[...], axis=-1, keepdims=True)          # (M, 1) = h @ (g2*wl)
    y = rstd * (s - mu2 * gwsum_ref[...]) + cb_ref[...]           # (M, 1)

    out_ref[0] = y.reshape(bblk, seq).astype(out_ref.dtype)


def _pick_bblk(batch, max_bblk):
    best = 1
    for cand in range(1, min(batch, max_bblk) + 1):
        if batch % cand == 0:
            best = cand
    return best


def varience_predictor(hi, params, *, ks, compute_dtype=jnp.bfloat16, max_bblk=8,
                       eps=1e-5):
    B, T, ni = hi.shape
    nf = params["g1"].shape[-1]
    # PyTorch 'same' alignment matches (ks-1)//2 only for odd kernel sizes.
    assert ks % 2 == 1, "only odd kernel sizes are supported (PyTorch-compatible padding)"
    pad = (ks - 1) // 2

    bblk = _pick_bblk(B, max_bblk)        # rows per grid step
    nb = B // bblk

    # Host-side weight prep:
    #  * im2col-flattened conv weights (cast for MXU),
    #  * LayerNorm2 + Linear folded:  gw = g2*wl,  gwsum = sum(gw),  cb = be2.wl + bl.
    w1 = params["w1"].reshape(ks * ni, nf).astype(compute_dtype)   # (ks*ni, nf)
    w2 = params["w2"].reshape(ks * nf, ni).astype(compute_dtype)   # (ks*nf, ni)
    wl = params["wl"].reshape(1, ni).astype(jnp.float32)
    gw = (params["g2"].reshape(1, ni).astype(jnp.float32) * wl)    # (1, ni)
    gwsum = jnp.sum(gw, axis=-1, keepdims=True)                    # (1, 1)
    cb = (jnp.sum(params["be2"].reshape(1, ni).astype(jnp.float32) * wl,
                  axis=-1, keepdims=True)
          + params["bl"].reshape(1, 1).astype(jnp.float32))        # (1, 1)

    def full(shape):
        zeros = (0,) * len(shape)
        return pl.BlockSpec(shape, lambda b, _z=zeros: _z)

    kernel = functools.partial(_vp_kernel, ks=ks, pad=pad, bblk=bblk, seq=T,
                               eps=eps, compute_dtype=compute_dtype)

    # Rough VMEM budget (double-buffered in/out blocks + resident params + intermediates),
    # clamped so it is safe on v7x's smaller 64 MiB VMEM.
    act_rows = bblk * T
    est = (2 * act_rows * ni * 4 + 2 * act_rows * 4
           + 2 * (w1.size + w2.size) * jnp.dtype(compute_dtype).itemsize
           + 4 * act_rows * (ks * max(ni, nf) + nf + ni) * 4)
    vmem_bytes = int(min(max(est, 16 * 1024 * 1024), 48 * 1024 * 1024))

    out = pl.pallas_call(
        kernel,
        out_shape=jax.ShapeDtypeStruct((nb, bblk, T), jnp.float32),
        grid_spec=pltpu.PrefetchScalarGridSpec(
            num_scalar_prefetch=0,
            grid=(nb,),                                     # one batch-block per grid step
            in_specs=[
                pl.BlockSpec((bblk, T, ni), lambda b: (b, 0, 0)),   # hi block
                full((ks * ni, nf)),   # conv1 weight (im2col-flattened)
                full((1, nf)),         # conv1 bias
                full((1, nf)),         # norm1 gamma
                full((1, nf)),         # norm1 beta
                full((ks * nf, ni)),   # conv2 weight (im2col-flattened)
                full((1, ni)),         # conv2 bias
                full((1, ni)),         # folded gamma2 * linear weight
                full((1, 1)),          # sum(gamma2 * linear weight)
                full((1, 1)),          # folded beta2.wl + linear bias
            ],
            out_specs=pl.BlockSpec((1, bblk, T), lambda b: (b, 0, 0)),
        ),
        compiler_params=pltpu.CompilerParams(
            dimension_semantics=("parallel",),
            vmem_limit_bytes=vmem_bytes,
        ),
    )(hi, w1, params["b1"], params["g1"], params["be1"],
      w2, params["b2"], gw, gwsum, cb)
    return out.reshape(B, T)[..., None]


def ref_forward(hi, p, *, ks):
    # Pure-JAX f32 reference mirroring the PyTorch forward (dropout in eval mode).
    pad = (ks - 1) // 2

    def conv1d(x, w, b):
        T = x.shape[1]
        xp = jnp.pad(x, ((0, 0), (pad, pad), (0, 0)))
        y = sum(jnp.einsum("btc,cd->btd", xp[:, k:k + T, :], w[k]) for k in range(ks))
        return y + b

    def ln(x, g, b, eps=1e-5):
        mu = x.mean(-1, keepdims=True)
        var = ((x - mu) ** 2).mean(-1, keepdims=True)
        return (x - mu) / jnp.sqrt(var + eps) * g + b

    x = jax.nn.relu(conv1d(hi, p["w1"], p["b1"]))
    x = ln(x, p["g1"], p["be1"])
    x = jax.nn.relu(conv1d(x, p["w2"], p["b2"]))
    x = ln(x, p["g2"], p["be2"])
    return x @ p["wl"] + p["bl"]


if __name__ == "__main__":
    B, T = 2, 16
    ni, nf, ks, p_drop = 32, 64, 3, 0.1   # p_drop unused (eval-mode dropout)

    key = jax.random.PRNGKey(0)
    keys = jax.random.split(key, 12)

    # PyTorch Conv1d weight is (Cout, Cin, ks); stored here as (ks, Cin, Cout).
    w1_torch = 0.1 * jax.random.normal(keys[0], (nf, ni, ks), jnp.float32)
    w2_torch = 0.1 * jax.random.normal(keys[1], (ni, nf, ks), jnp.float32)
    params = {
        "w1": jnp.transpose(w1_torch, (2, 1, 0)),
        "b1": 0.1 * jax.random.normal(keys[2], (1, nf), jnp.float32),
        "g1": 1.0 + 0.1 * jax.random.normal(keys[3], (1, nf), jnp.float32),
        "be1": 0.1 * jax.random.normal(keys[4], (1, nf), jnp.float32),
        "w2": jnp.transpose(w2_torch, (2, 1, 0)),
        "b2": 0.1 * jax.random.normal(keys[5], (1, ni), jnp.float32),
        "g2": 1.0 + 0.1 * jax.random.normal(keys[6], (1, ni), jnp.float32),
        "be2": 0.1 * jax.random.normal(keys[7], (1, ni), jnp.float32),
        "wl": 0.1 * jax.random.normal(keys[8], (ni, 1), jnp.float32),
        "bl": 0.1 * jax.random.normal(keys[9], (1, 1), jnp.float32),
    }
    hi = jax.random.normal(keys[10], (B, T, ni), jnp.float32)

    ref = ref_forward(hi, params, ks=ks)

    # Exactness check with f32 matmul operands.
    out_f32 = jax.block_until_ready(
        varience_predictor(hi, params, ks=ks, compute_dtype=jnp.float32))
    assert out_f32.shape == (B, T, 1)
    np.testing.assert_allclose(np.asarray(out_f32), np.asarray(ref), rtol=1e-4, atol=1e-4)

    # Default path: bf16 MXU operands, f32 accumulation / LN stats (looser tolerance).
    out_bf16 = jax.block_until_ready(varience_predictor(hi, params, ks=ks))
    assert out_bf16.shape == (B, T, 1)
    np.testing.assert_allclose(np.asarray(out_bf16), np.asarray(ref), rtol=5e-2, atol=5e-2)

    print("KERNEL_OK")
</pallas_src>

<mosaic_0001>
module attributes {stable_mosaic.version = 11 : i64} {
  func.func @_vp_kernel(%arg0: i32, %arg1: memref<2x16x32xf32, #tpu.memory_space<vmem>>, %arg2: memref<96x64xf32, #tpu.memory_space<vmem>>, %arg3: memref<1x64xf32, #tpu.memory_space<vmem>>, %arg4: memref<1x64xf32, #tpu.memory_space<vmem>>, %arg5: memref<1x64xf32, #tpu.memory_space<vmem>>, %arg6: memref<192x32xf32, #tpu.memory_space<vmem>>, %arg7: memref<1x32xf32, #tpu.memory_space<vmem>>, %arg8: memref<1x32xf32, #tpu.memory_space<vmem>>, %arg9: memref<1x1xf32, #tpu.memory_space<vmem>>, %arg10: memref<1x1xf32, #tpu.memory_space<vmem>>, %arg11: memref<1x2x16xf32, #tpu.memory_space<vmem>>) attributes {dimension_semantics = [#tpu.dimension_semantics<parallel>], iteration_bounds = array<i64: 1>, scalar_prefetch = 0 : i64, scratch_operands = 0 : i64, tpu.core_type = #tpu.core_type<tc>, window_params = [{transform_indices = @transform_0, window_bounds = array<i64: 2, 16, 32>}, {pipeline_mode = #tpu.pipeline_mode<synchronous>, transform_indices = @transform_1, window_bounds = array<i64: 96, 64>}, {pipeline_mode = #tpu.pipeline_mode<synchronous>, transform_indices = @transform_2, window_bounds = array<i64: 1, 64>}, {pipeline_mode = #tpu.pipeline_mode<synchronous>, transform_indices = @transform_3, window_bounds = array<i64: 1, 64>}, {pipeline_mode = #tpu.pipeline_mode<synchronous>, transform_indices = @transform_4, window_bounds = array<i64: 1, 64>}, {pipeline_mode = #tpu.pipeline_mode<synchronous>, transform_indices = @transform_5, window_bounds = array<i64: 192, 32>}, {pipeline_mode = #tpu.pipeline_mode<synchronous>, transform_indices = @transform_6, window_bounds = array<i64: 1, 32>}, {pipeline_mode = #tpu.pipeline_mode<synchronous>, transform_indices = @transform_7, window_bounds = array<i64: 1, 32>}, {pipeline_mode = #tpu.pipeline_mode<synchronous>, transform_indices = @transform_8, window_bounds = array<i64: 1, 1>}, {pipeline_mode = #tpu.pipeline_mode<synchronous>, transform_indices = @transform_9, window_bounds = array<i64: 1, 1>}, {transform_indices = @transform_10, window_bounds = array<i64: 1, 2, 16>}]} {
    %c0 = arith.constant 0 : index
    %c0_0 = arith.constant 0 : index
    %c0_1 = arith.constant 0 : index
    %0 = vector.load %arg1[%c0, %c0_0, %c0_1] : memref<2x16x32xf32, #tpu.memory_space<vmem>>, vector<2x16x32xf32>
    %1 = vector.shape_cast %0 : vector<2x16x32xf32> to vector<32x32xf32>
    %2 = tpu.iota {dimensions = array<i32: 0>} : vector<32x1xi32>
    %c16_i32 = arith.constant 16 : i32
    %c0_i32 = arith.constant 0 : i32
    %3 = arith.cmpi eq, %c16_i32, %c0_i32 : i32
    %c1_i32 = arith.constant 1 : i32
    %4 = arith.select %3, %c1_i32, %c16_i32 : i32
    %5 = vector.broadcast %4 : i32 to vector<32x1xi32>
    %6 = arith.remsi %2, %5 : vector<32x1xi32>
    %c0_i32_2 = arith.constant 0 : i32
    %7 = vector.broadcast %c0_i32_2 : i32 to vector<32x1xi32>
    %8 = arith.cmpi ne, %6, %7 : vector<32x1xi32>
    %c0_i32_3 = arith.constant 0 : i32
    %9 = vector.broadcast %c0_i32_3 : i32 to vector<32x1xi32>
    %10 = arith.cmpi slt, %6, %9 : vector<32x1xi32>
    %c0_i32_4 = arith.constant 0 : i32
    %11 = arith.cmpi slt, %4, %c0_i32_4 : i32
    %12 = vector.broadcast %11 : i1 to vector<32x1xi1>
    %13 = vector.broadcast %12 : vector<32x1xi1> to vector<32x1xi1>
    %14 = arith.xori %10, %13 : vector<32x1xi1>
    %15 = arith.andi %14, %8 : vector<32x1xi1>
    %16 = vector.broadcast %4 : i32 to vector<32x1xi32>
    %17 = arith.addi %6, %16 : vector<32x1xi32>
    %18 = arith.select %15, %17, %6 : vector<32x1xi1>, vector<32x1xi32>
    %c-1_i32 = arith.constant -1 : i32
    %19 = vector.broadcast %c-1_i32 : i32 to vector<32x1xi32>
    %20 = arith.addi %18, %19 : vector<32x1xi32>
    %c0_i32_5 = arith.constant 0 : i32
    %21 = vector.broadcast %c0_i32_5 : i32 to vector<32x1xi32>
    %22 = arith.cmpi sge, %20, %21 : vector<32x1xi32>
    %c-1_i32_6 = arith.constant -1 : i32
    %23 = vector.broadcast %c-1_i32_6 : i32 to vector<32x1xi32>
    %24 = arith.addi %18, %23 : vector<32x1xi32>
    %c16_i32_7 = arith.constant 16 : i32
    %25 = vector.broadcast %c16_i32_7 : i32 to vector<32x1xi32>
    %26 = arith.cmpi slt, %24, %25 : vector<32x1xi32>
    %27 = arith.andi %22, %26 : vector<32x1xi1>
    %c1_i32_8 = arith.constant 1 : i32
    %28 = vector.broadcast %c1_i32_8 : i32 to vector<32x1xi32>
    %29 = arith.addi %18, %28 : vector<32x1xi32>
    %c0_i32_9 = arith.constant 0 : i32
    %30 = vector.broadcast %c0_i32_9 : i32 to vector<32x1xi32>
    %31 = arith.cmpi sge, %29, %30 : vector<32x1xi32>
    %c1_i32_10 = arith.constant 1 : i32
    %32 = vector.broadcast %c1_i32_10 : i32 to vector<32x1xi32>
    %33 = arith.addi %18, %32 : vector<32x1xi32>
    %c16_i32_11 = arith.constant 16 : i32
    %34 = vector.broadcast %c16_i32_11 : i32 to vector<32x1xi32>
    %35 = arith.cmpi slt, %33, %34 : vector<32x1xi32>
    %36 = arith.andi %31, %35 : vector<32x1xi1>
    %c1_i32_12 = arith.constant 1 : i32
    %37 = tpu.dynamic_rotate %1 by %c1_i32_12 dim 0 : vector<32x32xf32>, i32 -> vector<32x32xf32>
    %cst = arith.constant 0.000000e+00 : f32
    %38 = vector.shape_cast %27 : vector<32x1xi1> to vector<32x1xi1>
    %39 = vector.broadcast %38 : vector<32x1xi1> to vector<32x32xi1>
    %40 = vector.broadcast %cst : f32 to vector<32x32xf32>
    %41 = arith.select %39, %37, %40 : vector<32x32xi1>, vector<32x32xf32>
    %c31_i32 = arith.constant 31 : i32
    %42 = tpu.dynamic_rotate %1 by %c31_i32 dim 0 : vector<32x32xf32>, i32 -> vector<32x32xf32>
    %cst_13 = arith.constant 0.000000e+00 : f32
    %43 = vector.shape_cast %36 : vector<32x1xi1> to vector<32x1xi1>
    %44 = vector.broadcast %43 : vector<32x1xi1> to vector<32x32xi1>
    %45 = vector.broadcast %cst_13 : f32 to vector<32x32xf32>
    %46 = arith.select %44, %42, %45 : vector<32x32xi1>, vector<32x32xf32>
    %47 = tpu.concatenate %41, %1, %46 in 1 : vector<32x32xf32>, vector<32x32xf32>, vector<32x32xf32> -> vector<32x96xf32>
    %c0_14 = arith.constant 0 : index
    %c0_15 = arith.constant 0 : index
    %48 = vector.load %arg2[%c0_14, %c0_15] : memref<96x64xf32, #tpu.memory_space<vmem>>, vector<96x64xf32>
    %cst_16 = arith.constant dense<0.000000e+00> : vector<32x64xf32>
    %49 = tpu.matmul %47, %48, %cst_16 {dimension_numbers = #tpu.dot_dimension_numbers<[1], [0], [0], [1], [0, 0, 1, 1], [], []>} : vector<32x96xf32>, vector<96x64xf32>, vector<32x64xf32> -> vector<32x64xf32>
    %c0_17 = arith.constant 0 : index
    %c0_18 = arith.constant 0 : index
    %50 = vector.load %arg3[%c0_17, %c0_18] : memref<1x64xf32, #tpu.memory_space<vmem>>, vector<1x64xf32>
    %51 = vector.broadcast %50 : vector<1x64xf32> to vector<32x64xf32>
    %52 = arith.addf %49, %51 : vector<32x64xf32>
    %cst_19 = arith.constant 0.000000e+00 : f32
    %53 = vector.broadcast %cst_19 : f32 to vector<32x64xf32>
    %54 = arith.maximumf %52, %53 : vector<32x64xf32>
    %cst_20 = arith.constant dense<0.000000e+00> : vector<32xf32>
    %55 = vector.multi_reduction <add>, %54, %cst_20 [1] : vector<32x64xf32> to vector<32xf32>
    %56 = vector.shape_cast %55 : vector<32xf32> to vector<32x1xf32>
    %cst_21 = arith.constant 6.400000e+01 : f32
    %57 = vector.broadcast %cst_21 : f32 to vector<32x1xf32>
    %58 = arith.divf %56, %57 : vector<32x1xf32>
    %59 = arith.mulf %54, %54 : vector<32x64xf32>
    %cst_22 = arith.constant dense<0.000000e+00> : vector<32xf32>
    %60 = vector.multi_reduction <add>, %59, %cst_22 [1] : vector<32x64xf32> to vector<32xf32>
    %61 = vector.shape_cast %60 : vector<32xf32> to vector<32x1xf32>
    %cst_23 = arith.constant 6.400000e+01 : f32
    %62 = vector.broadcast %cst_23 : f32 to vector<32x1xf32>
    %63 = arith.divf %61, %62 : vector<32x1xf32>
    %64 = arith.mulf %58, %58 : vector<32x1xf32>
    %65 = arith.subf %63, %64 : vector<32x1xf32>
    %cst_24 = arith.constant 0.000000e+00 : f32
    %66 = vector.broadcast %cst_24 : f32 to vector<32x1xf32>
    %67 = arith.maximumf %65, %66 : vector<32x1xf32>
    %68 = vector.broadcast %58 : vector<32x1xf32> to vector<32x64xf32>
    %69 = arith.subf %54, %68 : vector<32x64xf32>
    %cst_25 = arith.constant 9.99999974E-6 : f32
    %70 = vector.broadcast %cst_25 : f32 to vector<32x1xf32>
    %71 = arith.addf %67, %70 : vector<32x1xf32>
    %72 = math.rsqrt %71 : vector<32x1xf32>
    %73 = vector.broadcast %72 : vector<32x1xf32> to vector<32x64xf32>
    %74 = arith.mulf %69, %73 : vector<32x64xf32>
    %c0_26 = arith.constant 0 : index
    %c0_27 = arith.constant 0 : index
    %75 = vector.load %arg4[%c0_26, %c0_27] : memref<1x64xf32, #tpu.memory_space<vmem>>, vector<1x64xf32>
    %76 = vector.broadcast %75 : vector<1x64xf32> to vector<32x64xf32>
    %77 = arith.mulf %74, %76 : vector<32x64xf32>
    %c0_28 = arith.constant 0 : index
    %c0_29 = arith.constant 0 : index
    %78 = vector.load %arg5[%c0_28, %c0_29] : memref<1x64xf32, #tpu.memory_space<vmem>>, vector<1x64xf32>
    %79 = vector.broadcast %78 : vector<1x64xf32> to vector<32x64xf32>
    %80 = arith.addf %77, %79 : vector<32x64xf32>
    %c1_i32_30 = arith.constant 1 : i32
    %81 = tpu.dynamic_rotate %80 by %c1_i32_30 dim 0 : vector<32x64xf32>, i32 -> vector<32x64xf32>
    %cst_31 = arith.constant 0.000000e+00 : f32
    %82 = vector.shape_cast %27 : vector<32x1xi1> to vector<32x1xi1>
    %83 = vector.broadcast %82 : vector<32x1xi1> to vector<32x64xi1>
    %84 = vector.broadcast %cst_31 : f32 to vector<32x64xf32>
    %85 = arith.select %83, %81, %84 : vector<32x64xi1>, vector<32x64xf32>
    %c31_i32_32 = arith.constant 31 : i32
    %86 = tpu.dynamic_rotate %80 by %c31_i32_32 dim 0 : vector<32x64xf32>, i32 -> vector<32x64xf32>
    %cst_33 = arith.constant 0.000000e+00 : f32
    %87 = vector.shape_cast %36 : vector<32x1xi1> to vector<32x1xi1>
    %88 = vector.broadcast %87 : vector<32x1xi1> to vector<32x64xi1>
    %89 = vector.broadcast %cst_33 : f32 to vector<32x64xf32>
    %90 = arith.select %88, %86, %89 : vector<32x64xi1>, vector<32x64xf32>
    %91 = tpu.concatenate %85, %80, %90 in 1 : vector<32x64xf32>, vector<32x64xf32>, vector<32x64xf32> -> vector<32x192xf32>
    %c0_34 = arith.constant 0 : index
    %c0_35 = arith.constant 0 : index
    %92 = vector.load %arg6[%c0_34, %c0_35] : memref<192x32xf32, #tpu.memory_space<vmem>>, vector<192x32xf32>
    %cst_36 = arith.constant dense<0.000000e+00> : vector<32x32xf32>
    %93 = tpu.matmul %91, %92, %cst_36 {dimension_numbers = #tpu.dot_dimension_numbers<[1], [0], [0], [1], [0, 0, 1, 1], [], []>} : vector<32x192xf32>, vector<192x32xf32>, vector<32x32xf32> -> vector<32x32xf32>
    %c0_37 = arith.constant 0 : index
    %c0_38 = arith.constant 0 : index
    %94 = vector.load %arg7[%c0_37, %c0_38] : memref<1x32xf32, #tpu.memory_space<vmem>>, vector<1x32xf32>
    %95 = vector.broadcast %94 : vector<1x32xf32> to vector<32x32xf32>
    %96 = arith.addf %93, %95 : vector<32x32xf32>
    %cst_39 = arith.constant 0.000000e+00 : f32
    %97 = vector.broadcast %cst_39 : f32 to vector<32x32xf32>
    %98 = arith.maximumf %96, %97 : vector<32x32xf32>
    %cst_40 = arith.constant dense<0.000000e+00> : vector<32xf32>
    %99 = vector.multi_reduction <add>, %98, %cst_40 [1] : vector<32x32xf32> to vector<32xf32>
    %100 = vector.shape_cast %99 : vector<32xf32> to vector<32x1xf32>
    %cst_41 = arith.constant 3.200000e+01 : f32
    %101 = vector.broadcast %cst_41 : f32 to vector<32x1xf32>
    %102 = arith.divf %100, %101 : vector<32x1xf32>
    %103 = arith.mulf %98, %98 : vector<32x32xf32>
    %cst_42 = arith.constant dense<0.000000e+00> : vector<32xf32>
    %104 = vector.multi_reduction <add>, %103, %cst_42 [1] : vector<32x32xf32> to vector<32xf32>
    %105 = vector.shape_cast %104 : vector<32xf32> to vector<32x1xf32>
    %cst_43 = arith.constant 3.200000e+01 : f32
    %106 = vector.broadcast %cst_43 : f32 to vector<32x1xf32>
    %107 = arith.divf %105, %106 : vector<32x1xf32>
    %108 = arith.mulf %102, %102 : vector<32x1xf32>
    %109 = arith.subf %107, %108 : vector<32x1xf32>
    %cst_44 = arith.constant 0.000000e+00 : f32
    %110 = vector.broadcast %cst_44 : f32 to vector<32x1xf32>
    %111 = arith.maximumf %109, %110 : vector<32x1xf32>
    %cst_45 = arith.constant 9.99999974E-6 : f32
    %112 = vector.broadcast %cst_45 : f32 to vector<32x1xf32>
    %113 = arith.addf %111, %112 : vector<32x1xf32>
    %114 = math.rsqrt %113 : vector<32x1xf32>
    %c0_46 = arith.constant 0 : index
    %c0_47 = arith.constant 0 : index
    %115 = vector.load %arg8[%c0_46, %c0_47] : memref<1x32xf32, #tpu.memory_space<vmem>>, vector<1x32xf32>
    %116 = vector.broadcast %115 : vector<1x32xf32> to vector<32x32xf32>
    %117 = arith.mulf %98, %116 : vector<32x32xf32>
    %cst_48 = arith.constant dense<0.000000e+00> : vector<32xf32>
    %118 = vector.multi_reduction <add>, %117, %cst_48 [1] : vector<32x32xf32> to vector<32xf32>
    %119 = vector.shape_cast %118 : vector<32xf32> to vector<32x1xf32>
    %c0_49 = arith.constant 0 : index
    %c0_50 = arith.constant 0 : index
    %120 = vector.load %arg9[%c0_49, %c0_50] : memref<1x1xf32, #tpu.memory_space<vmem>>, vector<1x1xf32>
    %121 = vector.broadcast %120 : vector<1x1xf32> to vector<32x1xf32>
    %122 = arith.mulf %102, %121 : vector<32x1xf32>
    %123 = arith.subf %119, %122 : vector<32x1xf32>
    %124 = arith.mulf %114, %123 : vector<32x1xf32>
    %c0_51 = arith.constant 0 : index
    %c0_52 = arith.constant 0 : index
    %125 = vector.load %arg10[%c0_51, %c0_52] : memref<1x1xf32, #tpu.memory_space<vmem>>, vector<1x1xf32>
    %126 = vector.broadcast %125 : vector<1x1xf32> to vector<32x1xf32>
    %127 = arith.addf %124, %126 : vector<32x1xf32>
    %128 = vector.shape_cast %127 : vector<32x1xf32> to vector<2x16xf32>
    %c0_53 = arith.constant 0 : index
    %c0_54 = arith.constant 0 : index
    %c0_55 = arith.constant 0 : index
    %129 = vector.load %arg11[%c0_53, %c0_54, %c0_55] : memref<1x2x16xf32, #tpu.memory_space<vmem>>, vector<1x2x16xf32>
    %130 = vector.shape_cast %129 : vector<1x2x16xf32> to vector<2x16xf32>
    %131 = vector.shape_cast %128 : vector<2x16xf32> to vector<1x2x16xf32>
    tpu.vector_store %arg11[%c0_53, %c0_54, %c0_55], %131 {strides = array<i32>} : memref<1x2x16xf32, #tpu.memory_space<vmem>>, vector<1x2x16xf32>,
    return
  }
  func.func @transform_0(%arg0: i32) -> (i32, i32, i32) {
    %c0_i32 = arith.constant 0 : i32
    %c0_i32_0 = arith.constant 0 : i32
    %c0_i32_1 = arith.constant 0 : i32
    return %arg0, %c0_i32, %c0_i32_0 : i32, i32, i32
  }
  func.func @transform_1(%arg0: i32) -> (i32, i32) {
    %c0_i32 = arith.constant 0 : i32
    %c0_i32_0 = arith.constant 0 : i32
    %c0_i32_1 = arith.constant 0 : i32
    return %c0_i32, %c0_i32_0 : i32, i32
  }
  func.func @transform_2(%arg0: i32) -> (i32, i32) {
    %c0_i32 = arith.constant 0 : i32
    %c0_i32_0 = arith.constant 0 : i32
    %c0_i32_1 = arith.constant 0 : i32
    return %c0_i32, %c0_i32_0 : i32, i32
  }
  func.func @transform_3(%arg0: i32) -> (i32, i32) {
    %c0_i32 = arith.constant 0 : i32
    %c0_i32_0 = arith.constant 0 : i32
    %c0_i32_1 = arith.constant 0 : i32
    return %c0_i32, %c0_i32_0 : i32, i32
  }
  func.func @transform_4(%arg0: i32) -> (i32, i32) {
    %c0_i32 = arith.constant 0 : i32
    %c0_i32_0 = arith.constant 0 : i32
    %c0_i32_1 = arith.constant 0 : i32
    return %c0_i32, %c0_i32_0 : i32, i32
  }
  func.func @transform_5(%arg0: i32) -> (i32, i32) {
    %c0_i32 = arith.constant 0 : i32
    %c0_i32_0 = arith.constant 0 : i32
    %c0_i32_1 = arith.constant 0 : i32
    return %c0_i32, %c0_i32_0 : i32, i32
  }
  func.func @transform_6(%arg0: i32) -> (i32, i32) {
    %c0_i32 = arith.constant 0 : i32
    %c0_i32_0 = arith.constant 0 : i32
    %c0_i32_1 = arith.constant 0 : i32
    return %c0_i32, %c0_i32_0 : i32, i32
  }
  func.func @transform_7(%arg0: i32) -> (i32, i32) {
    %c0_i32 = arith.constant 0 : i32
    %c0_i32_0 = arith.constant 0 : i32
    %c0_i32_1 = arith.constant 0 : i32
    return %c0_i32, %c0_i32_0 : i32, i32
  }
  func.func @transform_8(%arg0: i32) -> (i32, i32) {
    %c0_i32 = arith.constant 0 : i32
    %c0_i32_0 = arith.constant 0 : i32
    %c0_i32_1 = arith.constant 0 : i32
    return %c0_i32, %c0_i32_0 : i32, i32
  }
  func.func @transform_9(%arg0: i32) -> (i32, i32) {
    %c0_i32 = arith.constant 0 : i32
    %c0_i32_0 = arith.constant 0 : i32
    %c0_i32_1 = arith.constant 0 : i32
    return %c0_i32, %c0_i32_0 : i32, i32
  }
  func.func @transform_10(%arg0: i32) -> (i32, i32, i32) {
    %c0_i32 = arith.constant 0 : i32
    %c0_i32_0 = arith.constant 0 : i32
    %c0_i32_1 = arith.constant 0 : i32
    return %arg0, %c0_i32, %c0_i32_0 : i32, i32, i32
  }
}

</mosaic_0001>

<bundles_post_ra>
// kernel: tpu_custom_call.1
= control target key start
LH: loop header
LB: loop body
LE: loop exit
PB: predicated region body
PF: predicated region fallthrough
CT: control target
= control target key end

     0   :  { %s1252_s0 = inlined_call_operand.vmem [shape: f32[2,16,32], index: 0, kind: input, shape index: {}]   ;;  %s1253_s1 = inlined_call_operand.vmem [shape: f32[96,64], index: 1, kind: input, shape index: {}]   ;;  %s1254_s2 = inlined_call_operand.vmem [shape: f32[1,64], index: 2, kind: input, shape index: {}]   ;;  %s1255_s3 = inlined_call_operand.vmem [shape: f32[1,64], index: 3, kind: input, shape index: {}]   ;;  %s1256_s4 = inlined_call_operand.vmem [shape: f32[1,64], index: 4, kind: input, shape index: {}]   ;;  %s1257_s5 = inlined_call_operand.vmem [shape: f32[192,32], index: 5, kind: input, shape index: {}]   ;;  %s1258_s6 = inlined_call_operand.vmem [shape: f32[1,32], index: 6, kind: input, shape index: {}]   ;;  %s1259_s7 = inlined_call_operand.vmem [shape: f32[1,32], index: 7, kind: input, shape index: {}]   ;;  %s1260_s8 = inlined_call_operand.<no memory space> [shape: f32[1,1], index: 8, kind: input, shape index: {}]   ;;  %s1261_s10 = inlined_call_operand.hbm [shape: f32[1,2,16], index: 10, kind: output, shape index: {}]   ;;  %s1262_s9 = inlined_call_operand.<no memory space> [shape: f32[1,1], index: 9, kind: input, shape index: {}]  }
   0x1   :  { %v15_v0 = vstv %s1260_s8  ;;  %v17_v1 = vstv %s1262_s9 }
   0x2   :  { %16 = vst [vmem:[#allocation2] sm:$0x1] %v15_v0  ;;  %18 = vst [vmem:[#allocation3] sm:$0x1] %v17_v1 }
   0x3   :  { %v40_v2 = vld [vmem:[%s1252_s0] sm:$0xff]  ;;  %v41_v3 = vld [vmem:[%s1252_s0 + $0x8] sm:$0xff]  ;;  %v44_v4 = vlaneseq  ;;  %s870_s21 = smov 32   ;;  %v42_v7 = vld [vmem:[%s1252_s0 + $0x10] sm:$0xff] }
   0x4   :  { %175 = vrot.lane.b32.xlu0 %v40_v2, %s870_s21  ;;  %v150_v5 = vrot.slane %v40_v2, 1  ;;  %v151_v6 = vrot.slane %v41_v3, 1  ;;  %v224_v8 = vld [vmem:[%s1253_s1 + $0x58] sm:$0xff]  ;;  %v223_v11 = vld [vmem:[%s1253_s1 + $0x50] sm:$0xff]  ;;  %v129_v12 = vrot.slane %v40_v2, 7  ;;  %v130_v14 = vrot.slane %v41_v3, 7 }
   0x5   :  { %v950_v9 = vshrl.u32 %v44_v4, 7  ;;  %v43_v10 = vld [vmem:[%s1252_s0 + $0x18] sm:$0xff]  ;;  %795 = vmatprep.subr.mxu0 %v224_v8  ;;  %v152_v16 = vrot.slane %v42_v7, 1  ;;  %v222_v18 = vld [vmem:[%s1253_s1 + $0x48] sm:$0xff]  ;;  %s871_s0 = smov 64   ;;  %v221_v23 = vld [vmem:[%s1253_s1 + $0x40] sm:$0xff] }
   0x6   :  { %v132_v13 = vrot.slane %v43_v10, 7  ;;  %796 = vmatpush3.msra.mxu0 %v224_v8  ;;  %v153_v20 = vrot.slane %v43_v10, 1 }
   0x7   :  { %vm154_vm0 = vcmp.lt.s32.totalorder %v950_v9, 7  ;;  %v46_v15 = vadd.s32 8, %v950_v9  ;;  %v48_v17 = vadd.s32 24, %v950_v9  ;;  %797 = vmatprep.subr.mxu0 %v223_v11  ;;  %vm133_vm1 = vcmp.lt.s32.totalorder %v950_v9, 1 }
   0x8   :  { %v157_v19 = vsel %vm154_vm0, %v150_v5, %v151_v6  ;;  %177 = vrot.lane.b32.xlu0 %v41_v3, %s870_s21  ;;  %798 = vmatpush3.msra.mxu0 %v223_v11 }
   0x9   :  { %191 = vrot.lane.b32.xlu1 %v157_v19, %s871_s0  ;;  %v60_v21 = vand.u32 15, %v46_v15  ;;  %v74_v22 = vand.u32 15, %v48_v17 }
   0xa   :  { %19 = vsyncpa [#allocation5], 0  ;;  %799 = vmatprep.subr.mxu0 %v222_v18  ;;  %v137_v24 = vsel %vm133_vm1, %v132_v13, %v129_v12  ;;  %v976_v25 = vsel %vm133_vm1, %v129_v12, %v130_v14  ;;  %v131_v26 = vrot.slane %v42_v7, 7  ;;  %v156_v28 = vsel %vm154_vm0, %v151_v6, %v152_v16  ;;  %v220_v29 = vld [vmem:[%s1253_s1 + $0x38] sm:$0xff]  ;;  %v219_v34 = vld [vmem:[%s1253_s1 + $0x30] sm:$0xff] }
   0xb   :  { %v978_v27 = vadd.s32 1, %v60_v21  ;;  %800 = vmatpush3.msra.mxu0 %v222_v18  ;;  %v155_v32 = vsel %vm154_vm0, %v152_v16, %v153_v20  ;;  %v995_v33 = vadd.s32 1, %v74_v22  ;;  %v218_v36 = vld [vmem:[%s1253_s1 + $0x28] sm:$0xff]  ;;  %v158_v37 = vsel %vm154_vm0, %v153_v20, %v150_v5  ;;  %v217_v38 = vld [vmem:[%s1253_s1 + $0x20] sm:$0xff]  ;;  %v216_v39 = vld [vmem:[%s1253_s1 + $0x18] sm:$0xff] }
   0xc   :  { %179 = vrot.lane.b32.xlu0 %v42_v7, %s870_s21  ;;  %801 = vmatprep.subr.mxu0 %v221_v23  ;;  %v135_v30 = vsel %vm133_vm1, %v130_v14, %v131_v26  ;;  %v990_v31 = vsel %vm133_vm1, %v131_v26, %v132_v13  ;;  %v215_v41 = vld [vmem:[%s1253_s1 + $0x10] sm:$0xff]  ;;  %v214_v42 = vld [vmem:[%s1253_s1 + $0x8] sm:$0xff]  ;;  %v213_v43 = vld [vmem:[%s1253_s1] sm:$0xff]  ;;  %v53_v44 = vand.u32 15, %v950_v9  ;;  %v47_v45 = vadd.s32 16, %v950_v9 }
   0xd   :  { %vm122_vm2 = vcmp.lt.s32.totalorder %v978_v27, 16  ;;  %802 = vmatpush3.msra.mxu0 %v221_v23  ;;  %vm124_vm3 = vcmp.lt.s32.totalorder %v995_v33, 16  ;;  %vm203_vm5 = vcmask 261120   ;;  %vm208_vm6 = vcmask 523264   ;;  %v764_v5 = vld [vmem:[%s1254_s2] ss:$0 sm:$0xff] }
   0xe   :  { %v168_v35 = vsel %vm122_vm2, %v156_v28, 0.0  ;;  %803 = vmatprep.subr.mxu0 %v220_v29  ;;  %v170_v40 = vsel %vm124_vm3, %v158_v37, 0.0  ;;  %v1031_v46 = vadd.s32 4294967295, %v53_v44  ;;  %v67_v47 = vand.u32 15, %v47_v45  ;;  %v476_v37 = vld [vmem:[%s1257_s5 + $0x58] sm:$0xff]  ;;  %v469_v44 = vld [vmem:[%s1257_s5 + $0x20] sm:$0xff] }
   0xf   :  { %193 = vrot.lane.b32.xlu1 %v168_v35, %s871_s0  ;;  %804 = vmatpush3.msra.mxu0 %v220_v29  ;;  %vm232_vm7 = vcmask 785408   ;;  %v478_v35 = vld [vmem:[%s1257_s5 + $0x68] sm:$0xff]  ;;  %v468_v45 = vld [vmem:[%s1257_s5 + $0x18] sm:$0xff]  ;;  %vm734_vm9 = vcmask 130112   ;;  %vm745_vm10 = vcmask 1041409   ;;  %vm748_vm11 = vcmask 123904  }
  0x10   :  { %195 = vrot.lane.b32.xlu0 %v155_v32, %s871_s0  ;;  %805 = vmatprep.subr.mxu0 %v219_v34  ;;  %vm101_vm4 = vcmp.ge.s32.totalorder %v1031_v46, 0  ;;  %v1036_v50 = vadd.s32 4294967295, %v67_v47  ;;  %v872_v32 = vmov 0.0   ;;  %v467_v47 = vld [vmem:[%s1257_s5 + $0x10] sm:$0xff] }
  0x11   :  { %806 = vmatpush3.msra.mxu0 %v219_v34  ;;  %v146_v49 = vsel %vm101_vm4, %v137_v24, 0.0  ;;  %508 = vmatprep.subr.mxu1 %v872_v32  ;;  %v479_v34 = vld [vmem:[%s1257_s5 + $0x70] sm:$0xff] }
  0x12   :  { %807 = vmatprep.subr.mxu0 %v218_v36  ;;  %vm103_vm8 = vcmp.ge.s32.totalorder %v1036_v50, 0 }
  0x13   :  { %181 = vrot.lane.b32.xlu1 %v43_v10, %s870_s21  ;;  %808 = vmatpush3.msra.mxu0 %v218_v36  ;;  %v148_v55 = vsel %vm103_vm8, %v135_v30, 0.0  ;;  %v477_v36 = vld [vmem:[%s1257_s5 + $0x60] sm:$0xff] }
  0x14   :  { %809 = vmatprep.subr.mxu0 %v217_v38 }
  0x15   :  { %810 = vmatpush3.msra.mxu0 %v217_v38  ;;  %v475_v38 = vld [vmem:[%s1257_s5 + $0x50] sm:$0xff] }
  0x16   :  { %811 = vmatprep.subr.mxu0 %v216_v39 }
  0x17   :  { %197 = vrot.lane.b32.xlu1 %v170_v40, %s871_s0  ;;  %812 = vmatpush3.msra.mxu0 %v216_v39  ;;  %v474_v39 = vld [vmem:[%s1257_s5 + $0x48] sm:$0xff]  ;;  %v473_v40 = vld [vmem:[%s1257_s5 + $0x40] sm:$0xff] }
  0x18   :  { %813 = vmatprep.subr.mxu0 %v215_v41 }
  0x19   :  { %814 = vmatpush3.msra.mxu0 %v215_v41  ;;  %v472_v41 = vld [vmem:[%s1257_s5 + $0x38] sm:$0xff] }
  0x1a   :  { %815 = vmatprep.subr.mxu0 %v214_v42 }
  0x1b   :  { %816 = vmatpush3.msra.mxu0 %v214_v42  ;;  %v471_v42 = vld [vmem:[%s1257_s5 + $0x30] sm:$0xff] }
  0x1c   :  { %817 = vmatprep.subr.mxu0 %v213_v43 }
  0x1d   :  { %818 = vmatpush3.msra.mxu0 %v213_v43  ;;  %v470_v43 = vld [vmem:[%s1257_s5 + $0x28] sm:$0xff] }
  0x76   :  { %v176_v48 = vpop.permute.xlu0 %175 }
  0x77   :  { %v204_v51 = vsel %vm203_vm5, %v146_v49, %v176_v48  ;;  %v466_v48 = vld [vmem:[%s1257_s5 + $0x8] sm:$0xff]  ;;  %v465_v49 = vld [vmem:[%s1257_s5] sm:$0xff] }
  0x7a   :  { %v178_v52 = vpop.permute.xlu0 %177 }
  0x7b   :  { %v192_v53 = vpop.permute.xlu1 %191  ;;  %v205_v57 = vsel %vm203_vm5, %v976_v25, %v178_v52  ;;  %v487_v52 = vld [vmem:[%s1257_s5 + $0xb0] sm:$0xff] }
  0x7c   :  { %v209_v54 = vsel %vm208_vm6, %v204_v51, %v192_v53  ;;  %v488_v51 = vld [vmem:[%s1257_s5 + $0xb8] sm:$0xff]  ;;  %v486_v53 = vld [vmem:[%s1257_s5 + $0xa8] sm:$0xff] }
  0x7d   :  { %819 = vmatprep.mubr.msk.f32.mxu0 %vm232_vm7, %v209_v54  ;;  %v485_v54 = vld [vmem:[%s1257_s5 + $0xa0] sm:$0xff] }
  0x7e   :  { %v180_v56 = vpop.permute.xlu0 %179 }
  0x7f   :  { %v206_v58 = vsel %vm203_vm5, %v148_v55, %v180_v56  ;;  %v484_v55 = vld [vmem:[%s1257_s5 + $0x98] sm:$0xff]  ;;  %v483_v56 = vld [vmem:[%s1257_s5 + $0x90] sm:$0xff] }
  0x81   :  { %v194_v59 = vpop.permute.xlu1 %193 }
  0x82   :  { %v210_v60 = vsel %vm208_vm6, %v205_v57, %v194_v59  ;;  %v196_v61 = vpop.permute.xlu0 %195  ;;  %v482_v57 = vld [vmem:[%s1257_s5 + $0x88] sm:$0xff] }
  0x83   :  { %820 = vmatmul.mubr.msk.f32.vlgmr.msra.gmra.mxu0 %vm232_vm7, %v210_v60  ;;  %v211_v62 = vsel %vm208_vm6, %v206_v58, %v196_v61 }
  0x84   :  { %822 = vmatprep.mubr.msk.f32.mxu0 %vm232_vm7, %v211_v62 }
  0x85   :  { %v182_v63 = vpop.permute.xlu1 %181 }
  0x86   :  { %v207_v0 = vsel %vm203_vm5, %v990_v31, %v182_v63  ;;  %v480_v31 = vld [vmem:[%s1257_s5 + $0x78] sm:$0xff] }
  0x87   :  { %509 = vmatpush1.msra.mxu1 %v480_v31 }
  0x88   :  { %510 = vmatprep.subr.mxu1 %v872_v32 }
  0x89   :  { %v198_v1 = vpop.permute.xlu1 %197  ;;  %511 = vmatpush1.msra.mxu1 %v479_v34 }
  0x8a   :  { %v212_v2 = vsel %vm208_vm6, %v207_v0, %v198_v1  ;;  %512 = vmatprep.subr.mxu1 %v872_v32 }
  0x8b   :  { %823 = vmatmul.mubr.msk.f32.gmra.mxu0 %vm232_vm7, %v212_v2  ;;  %513 = vmatpush1.msra.mxu1 %v478_v35 }
  0x8c   :  { %514 = vmatprep.subr.mxu1 %v872_v32 }
  0x8d   :  { %515 = vmatpush1.msra.mxu1 %v477_v36 }
  0x8e   :  { %516 = vmatprep.subr.mxu1 %v872_v32 }
  0x8f   :  { %517 = vmatpush1.msra.mxu1 %v476_v37  ;;  %v769_v37 = vld [vmem:[%s1255_s3] ss:$0 sm:$0xff] }
  0x90   :  { %518 = vmatprep.subr.mxu1 %v872_v32 }
  0x91   :  { %519 = vmatpush1.msra.mxu1 %v475_v38 }
  0x92   :  { %520 = vmatprep.subr.mxu1 %v872_v32 }
  0x93   :  { %521 = vmatpush1.msra.mxu1 %v474_v39  ;;  %v770_v39 = vld [vmem:[%s1256_s4] ss:$0 sm:$0xff] }
  0x94   :  { %522 = vmatprep.subr.mxu1 %v872_v32 }
  0x95   :  { %523 = vmatpush1.msra.mxu1 %v473_v40 }
  0x96   :  { %524 = vmatprep.subr.mxu1 %v872_v32 }
  0x97   :  { %525 = vmatpush1.msra.mxu1 %v472_v41 }
  0x98   :  { %526 = vmatprep.subr.mxu1 %v872_v32 }
  0x99   :  { %527 = vmatpush1.msra.mxu1 %v471_v42 }
  0x9a   :  { %528 = vmatprep.subr.mxu1 %v872_v32 }
  0x9b   :  { %529 = vmatpush1.msra.mxu1 %v470_v43 }
  0x9c   :  { %530 = vmatprep.subr.mxu1 %v872_v32 }
  0x9d   :  { %531 = vmatpush1.msra.mxu1 %v469_v44 }
  0x9e   :  { %532 = vmatprep.subr.mxu1 %v872_v32 }
  0x9f   :  { %533 = vmatpush1.msra.mxu1 %v468_v45 }
  0xa0   :  { %534 = vmatprep.subr.mxu1 %v872_v32 }
  0xa1   :  { %535 = vmatpush1.msra.mxu1 %v467_v47 }
  0xa2   :  { %536 = vmatprep.subr.mxu1 %v872_v32 }
  0xa3   :  { %537 = vmatpush1.msra.mxu1 %v466_v48 }
  0xa4   :  { %538 = vmatprep.subr.mxu1 %v872_v32 }
  0xa5   :  { %539 = vmatpush1.msra.mxu1 %v465_v49 }
  0xa6   :  { %556 = vmatprep.subr.mxu1 %v872_v32 }
  0xa7   :  { %557 = vmatpush2.msra.mxu1 %v488_v51 }
  0xa8   :  { %558 = vmatprep.subr.mxu1 %v872_v32 }
  0xa9   :  { %559 = vmatpush2.msra.mxu1 %v487_v52 }
  0xaa   :  { %560 = vmatprep.subr.mxu1 %v872_v32 }
  0xab   :  { %561 = vmatpush2.msra.mxu1 %v486_v53 }
  0xac   :  { %562 = vmatprep.subr.mxu1 %v872_v32 }
  0xad   :  { %563 = vmatpush2.msra.mxu1 %v485_v54 }
  0xae   :  { %564 = vmatprep.subr.mxu1 %v872_v32 }
  0xaf   :  { %565 = vmatpush2.msra.mxu1 %v484_v55 }
  0xb0   :  { %566 = vmatprep.subr.mxu1 %v872_v32 }
  0xb1   :  { %567 = vmatpush2.msra.mxu1 %v483_v56 }
  0xb2   :  { %568 = vmatprep.subr.mxu1 %v872_v32 }
  0xb3   :  { %569 = vmatpush2.msra.mxu1 %v482_v57 }
  0xb4   :  { %570 = vmatprep.subr.mxu1 %v872_v32 }
 0x143   :  { %v821_v3 = vpop.f32.mrf.mxu0 }
 0x144   :  { %v317_v7 = vadd.f32 %v821_v3, %v764_v5 }
 0x145   :  { %v311_v6 = vpop.f32.mrf.mxu0 }
 0x146   :  { %v312_v8 = vadd.f32 %v764_v5, %v311_v6  ;;  %v1060_v11 = vmax.f32 %v317_v7, 0.0 }
 0x148   :  { %v1058_v10 = vmax.f32 %v312_v8, 0.0  ;;  %v337_v19 = vsel %vm208_vm6, %v1060_v11, 0.0  ;;  %v352_v20 = vmul.f32 %v1060_v11, %v1060_v11 }
 0x14a   :  { %v334_v12 = vsel %vm208_vm6, %v1058_v10, 0.0  ;;  %v351_v13 = vmul.f32 %v1058_v10, %v1058_v10  ;;  %v358_v24 = vsel %vm208_vm6, %v352_v20, 0.0 }
 0x14b   :  { %v824_v14 = vpop.f32.mrf.mxu0  ;;  %335 = vadd.xlane.f32.xlu0 %v334_v12 }
 0x14c   :  { %v355_v15 = vsel %vm208_vm6, %v351_v13, 0.0  ;;  %v327_v17 = vadd.f32 %v824_v14, %v764_v5 }
 0x14d   :  { %v321_v16 = vpop.f32.mrf.mxu0  ;;  %356 = vadd.xlane.f32.xlu1 %v355_v15 }
 0x14e   :  { %v322_v18 = vadd.f32 %v764_v5, %v321_v16  ;;  %v1073_v22 = vmax.f32 %v327_v17, 0.0 }
 0x14f   :  { %338 = vadd.xlane.f32.xlu0 %v337_v19 }
 0x150   :  { %v1071_v21 = vmax.f32 %v322_v18, 0.0  ;;  %v343_v26 = vsel %vm208_vm6, %v1073_v22, 0.0  ;;  %v354_v29 = vmul.f32 %v1073_v22, %v1073_v22 }
 0x152   :  { %v340_v23 = vsel %vm208_vm6, %v1071_v21, 0.0  ;;  %v353_v25 = vmul.f32 %v1071_v21, %v1071_v21  ;;  %v364_v30 = vsel %vm208_vm6, %v354_v29, 0.0  ;;  %v481_v29 = vld [vmem:[%s1257_s5 + $0x80] sm:$0xff] }
 0x153   :  { %341 = vadd.xlane.f32.xlu1 %v340_v23  ;;  %359 = vadd.xlane.f32.xlu0 %v358_v24 }
 0x154   :  { %v361_v28 = vsel %vm208_vm6, %v353_v25, 0.0  ;;  %571 = vmatpush2.msra.mxu1 %v481_v29 }
 0x157   :  { %344 = vadd.xlane.f32.xlu1 %v343_v26  ;;  %362 = vadd.xlane.f32.xlu0 %v361_v28 }
 0x15b   :  { %365 = vadd.xlane.f32.xlu0 %v364_v30 }
 0x1d4   :  { %v336_v58 = vpop.xlane.xlu0 %335 }
 0x1d5   :  { %v347_v59 = vmul.f32 0.015625, %v336_v58 }
 0x1d6   :  { %v357_v60 = vpop.xlane.xlu1 %356 }
 0x1d7   :  { %v371_v61 = vmul.f32 %v347_v59, %v347_v59  ;;  %v367_v62 = vmul.f32 0.015625, %v357_v60  ;;  %v383_v34 = vsub.f32 %v1058_v10, %v347_v59 }
 0x1d8   :  { %v339_v63 = vpop.xlane.xlu0 %338 }
 0x1d9   :  { %v375_v0 = vsub.f32 %v367_v62, %v371_v61  ;;  %v348_v1 = vmul.f32 0.015625, %v339_v63 }
 0x1db   :  { %v379_v2 = vmax.f32 %v375_v0, 0.0  ;;  %v372_v7 = vmul.f32 %v348_v1, %v348_v1  ;;  %v384_v41 = vsub.f32 %v1060_v11, %v348_v1 }
 0x1dc   :  { %v342_v3 = vpop.xlane.xlu1 %341  ;;  %v360_v5 = vpop.xlane.xlu0 %359 }
 0x1dd   :  { %v387_v6 = vadd.f32 1e-05, %v379_v2  ;;  %v349_v8 = vmul.f32 0.015625, %v342_v3  ;;  %v368_v12 = vmul.f32 0.015625, %v360_v5 }
 0x1df   :  { %832 = vrsqrt.f32 %v387_v6  ;;  %v376_v13 = vsub.f32 %v368_v12, %v372_v7  ;;  %v373_v16 = vmul.f32 %v349_v8, %v349_v8  ;;  %v385_v44 = vsub.f32 %v1071_v21, %v349_v8 }
 0x1e0   :  { %v345_v14 = vpop.xlane.xlu1 %344  ;;  %v363_v15 = vpop.xlane.xlu0 %362 }
 0x1e1   :  { %v380_v17 = vmax.f32 %v376_v13, 0.0  ;;  %v350_v18 = vmul.f32 0.015625, %v345_v14  ;;  %v369_v19 = vmul.f32 0.015625, %v363_v15 }
 0x1e3   :  { %v388_v20 = vadd.f32 1e-05, %v380_v17  ;;  %v377_v23 = vsub.f32 %v369_v19, %v373_v16  ;;  %v374_v25 = vmul.f32 %v350_v18, %v350_v18  ;;  %v386_v51 = vsub.f32 %v1073_v22, %v350_v18 }
 0x1e4   :  { %v366_v24 = vpop.xlane.xlu0 %365 }
 0x1e5   :  { %834 = vrsqrt.f32 %v388_v20  ;;  %v381_v26 = vmax.f32 %v377_v23, 0.0  ;;  %v370_v28 = vmul.f32 0.015625, %v366_v24  ;;  %v771_v23 = vld [vmem:[%s1258_s6] ss:$0 sm:$0xff] }
 0x1e7   :  { %v389_v30 = vadd.f32 1e-05, %v381_v26  ;;  %v378_v31 = vsub.f32 %v370_v28, %v374_v25 }
 0x1e9   :  { %836 = vrsqrt.f32 %v389_v30  ;;  %v382_v32 = vmax.f32 %v378_v31, 0.0 }
 0x1eb   :  { %v390_v35 = vadd.f32 1e-05, %v382_v32 }
 0x1ec   :  { %v833_v36 = vpop.eup %832 }
 0x1ed   :  { %838 = vrsqrt.f32 %v390_v35  ;;  %v395_v38 = vmul.f32 %v833_v36, %v383_v34 }
 0x1ef   :  { %v406_v40 = vmul.f32 %v769_v37, %v395_v38 }
 0x1f1   :  { %v417_v42 = vadd.f32 %v770_v39, %v406_v40 }
 0x1f2   :  { %v835_v43 = vpop.eup %834 }
 0x1f3   :  { %449 = vrot.lane.b32.xlu1 %v417_v42, %s871_s0  ;;  %v396_v10 = vmul.f32 %v835_v43, %v384_v41  ;;  %v421_v52 = vrot.slane %v417_v42, 7  ;;  %v433_v53 = vrot.slane %v417_v42, 1  ;;  %v776_v43 = vld [vmem:[%s1259_s7] ss:$0 sm:$0xff]  ;;  %s874_s7 = smov [#allocation4]  }
 0x1f5   :  { %v407_v45 = vmul.f32 %v769_v37, %v396_v10 }
 0x1f6   :  { %v837_v47 = vpop.eup %836 }
 0x1f7   :  { %v418_v48 = vadd.f32 %v770_v39, %v407_v45  ;;  %v397_v49 = vmul.f32 %v837_v47, %v385_v44 }
 0x1f9   :  { %451 = vrot.lane.b32.xlu0 %v418_v48, %s871_s0  ;;  %v434_v54 = vrot.slane %v418_v48, 1  ;;  %v408_v55 = vmul.f32 %v769_v37, %v397_v49  ;;  %v422_v11 = vrot.slane %v418_v48, 7 }
 0x1fa   :  { %v839_v56 = vpop.eup %838 }
 0x1fb   :  { %v439_v57 = vsel %vm154_vm0, %v433_v53, %v434_v54  ;;  %v419_v58 = vadd.f32 %v770_v39, %v408_v55  ;;  %v398_v59 = vmul.f32 %v839_v56, %v386_v51  ;;  %v427_v21 = vsel %vm133_vm1, %v421_v52, %v422_v11 }
 0x1fc   :  { %772 = vmatprep.mubr.msk.f32.mxu1 %vm208_vm6, %v439_v57 }
 0x1fd   :  { %453 = vrot.lane.b32.xlu1 %v419_v58, %s871_s0  ;;  %v423_v22 = vrot.slane %v419_v58, 7  ;;  %v435_v60 = vrot.slane %v419_v58, 1  ;;  %v409_v61 = vmul.f32 %v769_v37, %v398_v59 }
 0x1ff   :  { %v420_v62 = vadd.f32 %v770_v39, %v409_v61  ;;  %v438_v63 = vsel %vm154_vm0, %v434_v54, %v435_v60  ;;  %v426_v0 = vsel %vm133_vm1, %v422_v11, %v423_v22 }
 0x200   :  { %v442_v14 = vsel %vm122_vm2, %v438_v63, 0.0  ;;  %v431_v18 = vsel %vm103_vm8, %v426_v0, 0.0 }
 0x201   :  { %455 = vrot.lane.b32.xlu1 %v420_v62, %s871_s0  ;;  %v424_v1 = vrot.slane %v420_v62, 7  ;;  %v436_v2 = vrot.slane %v420_v62, 1  ;;  %s756_s0 = sshll.u32 %s874_s7, 4  ;;  %s757_s0 = int_to_ptr.vmem [resolvable:$true] %s756_s0 }
 0x202   :  { %s848_s30 = scalar_lea.vmem %s757_s0, 32  ;;  %p853_p1 = scmp.lt.s32.totalorder %s757_s0, %s757_s0 }
 0x203   :  { %v428_v3 = vsel %vm133_vm1, %v424_v1, %v421_v52  ;;  %v437_v5 = vsel %vm154_vm0, %v435_v60, %v436_v2  ;;  %v440_v6 = vsel %vm154_vm0, %v436_v2, %v433_v53  ;;  %v425_v7 = vsel %vm133_vm1, %v423_v22, %v424_v1  ;;  %p849_p0 = scmp.ne.s32.totalorder %s757_s0, %s848_s30  ;;  %p854_p2 = scmp.lt.s32.totalorder %s848_s30, %s848_s30 }
 0x204   :  { %v429_v12 = vsel %vm101_vm4, %v428_v3, 0.0  ;;  %v444_v19 = vsel %vm124_vm3, %v440_v6, 0.0  ;;  %v873_v22 = vmov 0  }
 0x205   :  { %830 = vset.pattern.permute.xlu1 %v873_v22  ;;  %831 = vset.pattern.permute.xlu0 %v873_v22  ;;  %p855_p3 = por %p854_p2, %p853_p1 }
 0x207   :  { %p856_p4 = pnand %p855_p3, %p849_p0 }
 0x265   :  { %v450_v8 = vpop.permute.xlu1 %449 }
 0x266   :  { %v461_v13 = vsel %vm208_vm6, %v429_v12, %v450_v8 }
 0x267   :  { %573 = vmatmul.mubr.f32.vlgmr.msra.gmra.mxu1 %v461_v13 }
 0x268   :  { %773 = vmatprep.mubr.msk.f32.mxu1 %vm208_vm6, %v442_v14 }
 0x26b   :  { %v452_v15 = vpop.permute.xlu0 %451 }
 0x26c   :  { %v462_v16 = vsel %vm208_vm6, %v427_v21, %v452_v15 }
 0x26d   :  { %578 = vmatmul.mubr.f32.gmra.mxu1 %v462_v16 }
 0x26e   :  { %774 = vmatprep.mubr.msk.f32.mxu1 %vm208_vm6, %v437_v5 }
 0x26f   :  { %v454_v17 = vpop.permute.xlu1 %453 }
 0x270   :  { %v463_v46 = vsel %vm208_vm6, %v431_v18, %v454_v17 }
 0x271   :  { %583 = vmatmul.mubr.f32.gmra.mxu1 %v463_v46 }
 0x272   :  { %775 = vmatprep.mubr.msk.f32.mxu1 %vm208_vm6, %v444_v19 }
 0x273   :  { %v456_v27 = vpop.permute.xlu1 %455 }
 0x274   :  { %v464_v20 = vsel %vm208_vm6, %v425_v7, %v456_v27 }
 0x275   :  { %588 = vmatmul.mubr.f32.gmra.mxu1 %v464_v20 }
 0x327   :  { %v574_v24 = vpop.f32.mrf.mxu1 }
 0x328   :  { %v575_v25 = vadd.f32 %v771_v23, %v574_v24  ;;  %v777_v24 = vld [vmem:[#allocation2] ss:$0 sm:$0xff] }
 0x329   :  { %v576_v50 = vpop.f32.mrf.mxu1 }
 0x32a   :  { %v593_v26 = vmax.f32 %v575_v25, 0.0 }
 0x32c   :  { %v597_v28 = vsel %vm203_vm5, %v593_v26, 0.0  ;;  %v614_v29 = vmul.f32 %v593_v26, %v593_v26  ;;  %v661_v51 = vmul.f32 %v776_v43, %v593_v26 }
 0x32d   :  { %598 = vadd.xlane.f32.xlu0 %v597_v28  ;;  %v579_v33 = vpop.f32.mrf.mxu1 }
 0x32e   :  { %v580_v30 = vadd.f32 %v771_v23, %v579_v33  ;;  %v618_v31 = vsel %vm203_vm5, %v614_v29, 0.0  ;;  %v665_v53 = vsel %vm203_vm5, %v661_v51, 0.0 }
 0x32f   :  { %619 = vadd.xlane.f32.xlu1 %v618_v31  ;;  %v581_v32 = vpop.f32.mrf.mxu1 }
 0x330   :  { %v594_v34 = vmax.f32 %v580_v30, 0.0 }
 0x331   :  { %v584_v35 = vpop.f32.mrf.mxu1 }
 0x332   :  { %v585_v36 = vadd.f32 %v771_v23, %v584_v35  ;;  %v600_v37 = vsel %vm203_vm5, %v594_v34, 0.0  ;;  %v615_v38 = vmul.f32 %v594_v34, %v594_v34  ;;  %v662_v57 = vmul.f32 %v776_v43, %v594_v34  ;;  %v778_v35 = vld [vmem:[#allocation3] ss:$0 sm:$0xff] }
 0x333   :  { %v586_v39 = vpop.f32.mrf.mxu1  ;;  %601 = vadd.xlane.f32.xlu1 %v600_v37 }
 0x334   :  { %v595_v40 = vmax.f32 %v585_v36, 0.0  ;;  %v621_v41 = vsel %vm203_vm5, %v615_v38, 0.0  ;;  %v668_v58 = vsel %vm203_vm5, %v662_v57, 0.0 }
 0x335   :  { %v589_v42 = vpop.f32.mrf.mxu1  ;;  %622 = vadd.xlane.f32.xlu0 %v621_v41 }
 0x336   :  { %v590_v10 = vadd.f32 %v771_v23, %v589_v42  ;;  %v616_v44 = vmul.f32 %v595_v40, %v595_v40  ;;  %v603_v48 = vsel %vm203_vm5, %v595_v40, 0.0  ;;  %v663_v55 = vmul.f32 %v776_v43, %v595_v40 }
 0x337   :  { %v591_v45 = vpop.f32.mrf.mxu1 }
 0x338   :  { %v596_v47 = vmax.f32 %v590_v10, 0.0  ;;  %v624_v49 = vsel %vm203_vm5, %v616_v44, 0.0  ;;  %v671_v56 = vsel %vm203_vm5, %v663_v55, 0.0 }
 0x339   :  { %604 = vadd.xlane.f32.xlu0 %v603_v48  ;;  %625 = vadd.xlane.f32.xlu1 %v624_v49 }
 0x33a   :  { %v606_v52 = vsel %vm203_vm5, %v596_v47, 0.0  ;;  %v617_v54 = vmul.f32 %v596_v47, %v596_v47  ;;  %v664_v59 = vmul.f32 %v776_v43, %v596_v47 }
 0x33c   :  { %v627_v11 = vsel %vm203_vm5, %v617_v54, 0.0  ;;  %v674_v21 = vsel %vm203_vm5, %v664_v59, 0.0 }
 0x33d   :  { %607 = vadd.xlane.f32.xlu0 %v606_v52  ;;  %666 = vadd.xlane.f32.xlu1 %v665_v53 }
 0x341   :  { %628 = vadd.xlane.f32.xlu0 %v627_v11  ;;  %672 = vadd.xlane.f32.xlu1 %v671_v56 }
 0x345   :  { %669 = vadd.xlane.f32.xlu0 %v668_v58  ;;  %v724_v58 = vand.u32 127, %v44_v4 }
 0x347   :  { %v729_v59 = vadd.s32 4294967288, %v724_v58 }
 0x349   :  { %675 = vadd.xlane.f32.xlu0 %v674_v21  ;;  %v732_v22 = vsub.s32 %v729_v59, %v950_v9 }
 0x3b6   :  { %v599_v60 = vpop.xlane.xlu0 %598 }
 0x3b7   :  { %v610_v61 = vmul.f32 0.03125, %v599_v60 }
 0x3b8   :  { %v620_v62 = vpop.xlane.xlu1 %619 }
 0x3b9   :  { %v634_v63 = vmul.f32 %v610_v61, %v610_v61  ;;  %v630_v0 = vmul.f32 0.03125, %v620_v62  ;;  %v684_v29 = vmul.f32 %v777_v24, %v610_v61  ;;  %v727_v62 = vsub.s32 %v724_v58, %v950_v9 }
 0x3bb   :  { %v638_v1 = vsub.f32 %v630_v0, %v634_v63 }
 0x3bc   :  { %v602_v2 = vpop.xlane.xlu1 %601 }
 0x3bd   :  { %v642_v3 = vmax.f32 %v638_v1, 0.0  ;;  %v611_v5 = vmul.f32 0.03125, %v602_v2 }
 0x3be   :  { %v623_v6 = vpop.xlane.xlu0 %622 }
 0x3bf   :  { %v646_v7 = vadd.f32 1e-05, %v642_v3  ;;  %v635_v8 = vmul.f32 %v611_v5, %v611_v5  ;;  %v631_v12 = vmul.f32 0.03125, %v623_v6  ;;  %v685_v40 = vmul.f32 %v777_v24, %v611_v5 }
 0x3c1   :  { %840 = vrsqrt.f32 %v646_v7  ;;  %v639_v13 = vsub.f32 %v631_v12, %v635_v8 }
 0x3c2   :  { %v626_v14 = vpop.xlane.xlu1 %625  ;;  %v605_v15 = vpop.xlane.xlu0 %604 }
 0x3c3   :  { %v643_v16 = vmax.f32 %v639_v13, 0.0  ;;  %v612_v17 = vmul.f32 0.03125, %v605_v15  ;;  %v632_v46 = vmul.f32 0.03125, %v626_v14 }
 0x3c5   :  { %v647_v18 = vadd.f32 1e-05, %v643_v16  ;;  %v636_v19 = vmul.f32 %v612_v17, %v612_v17  ;;  %v686_v45 = vmul.f32 %v777_v24, %v612_v17 }
 0x3c6   :  { %v608_v27 = vpop.xlane.xlu0 %607  ;;  %v667_v50 = vpop.xlane.xlu1 %666 }
 0x3c7   :  { %842 = vrsqrt.f32 %v647_v18  ;;  %v640_v20 = vsub.f32 %v632_v46, %v636_v19  ;;  %v613_v23 = vmul.f32 0.03125, %v608_v27  ;;  %v688_v31 = vsub.f32 %v667_v50, %v684_v29 }
 0x3c9   :  { %v644_v25 = vmax.f32 %v640_v20, 0.0  ;;  %v637_v33 = vmul.f32 %v613_v23, %v613_v23  ;;  %v687_v53 = vmul.f32 %v777_v24, %v613_v23 }
 0x3ca   :  { %v629_v26 = vpop.xlane.xlu0 %628  ;;  %v673_v44 = vpop.xlane.xlu1 %672 }
 0x3cb   :  { %v648_v28 = vadd.f32 1e-05, %v644_v25  ;;  %v633_v30 = vmul.f32 0.03125, %v629_v26  ;;  %v690_v48 = vsub.f32 %v673_v44, %v686_v45 }
 0x3cd   :  { %844 = vrsqrt.f32 %v648_v28  ;;  %v641_v32 = vsub.f32 %v633_v30, %v637_v33 }
 0x3ce   :  { %v841_v34 = vpop.eup %840  ;;  %v670_v38 = vpop.xlane.xlu0 %669 }
 0x3cf   :  { %v692_v36 = vmul.f32 %v841_v34, %v688_v31  ;;  %v645_v37 = vmax.f32 %v641_v32, 0.0  ;;  %v689_v42 = vsub.f32 %v670_v38, %v685_v40 }
 0x3d1   :  { %v649_v39 = vadd.f32 1e-05, %v645_v37  ;;  %v703_v41 = vadd.f32 %v778_v35, %v692_v36 }
 0x3d2   :  { %v676_v52 = vpop.xlane.xlu0 %675 }
 0x3d3   :  { %846 = vrsqrt.f32 %v649_v39  ;;  %712 = vperm.xlu1 %830, %v703_v41   ;;  %v691_v55 = vsub.f32 %v676_v52, %v687_v53 }
 0x3d4   :  { %v843_v43 = vpop.eup %842 }
 0x3d5   :  { %v693_v10 = vmul.f32 %v843_v43, %v689_v42 }
 0x3d7   :  { %v704_v47 = vadd.f32 %v778_v35, %v693_v10 }
 0x3d9   :  { %715 = vperm.xlu0 %831, %v704_v47  }
 0x3da   :  { %v845_v49 = vpop.eup %844 }
 0x3db   :  { %v694_v51 = vmul.f32 %v845_v49, %v690_v48 }
 0x3dd   :  { %v705_v54 = vadd.f32 %v778_v35, %v694_v51 }
 0x3df   :  { %718 = vperm.xlu1 %830, %v705_v54  }
 0x3e0   :  { %v847_v11 = vpop.eup %846 }
 0x3e1   :  { %v695_v56 = vmul.f32 %v847_v11, %v691_v55 }
 0x3e3   :  { %v706_v57 = vadd.f32 %v778_v35, %v695_v56 }
 0x3e5   :  { %721 = vperm.xlu1 %830, %v706_v57  }
 0x44e   :  { %v713_v21 = vpop.permute.xlu1 %712 }
 0x44f   :  { %v728_v1 = vrot.slane %v713_v21, %v727_v62 }
 0x454   :  { %v716_v60 = vpop.permute.xlu0 %715 }
 0x455   :  { %v733_v63 = vrot.slane %v716_v60, %v732_v22 }
 0x457   :  { %v735_v5 = vsel %vm734_vm9, %v733_v63, %v728_v1 }
 0x45a   :  { %v719_v61 = vpop.permute.xlu1 %718 }
 0x45b   :  { %v739_v2 = vrot.slane %v719_v61, %v727_v62 }
 0x460   :  { %v722_v0 = vpop.permute.xlu1 %721 }
 0x461   :  { %v743_v3 = vrot.slane %v722_v0, %v732_v22 }
 0x463   :  { %v744_v4 = vsel %vm734_vm9, %v743_v3, %v739_v2 }
 0x464   :  { %v746_v6 = vsel %vm745_vm10, %v744_v4, %v735_v5 }
 0x465   :  { %749 = vst.msk [vmem:[#allocation4] sm:$0x3] %vm748_vm11, %v746_v6 }
 0x466   :  { %859 = shalt.err (!%p856_p4)
}
 0x467   :  { %759 = dma.vmem_to_hbm [thread:$0]  %s757_s0, 32, %s1261_s10, [#allocation5]  }
 0x468   :  { %868 = dma.done.wait [#allocation5], 32  }
 0x469   :  { %869 = vsyncadd [#allocation5], 4294967264 }
 0x46a   :  { %763 = vsyncpa [#allocation5], 1 }

</bundles_post_ra>
